<compile_context>
chip_gen: v6e
topology: v6e:2x2x1
jax: 0.10.0
libtpu: 0.0.40
codegen_flags: <defaults>
</compile_context>

<pallas_src>
import jax
import jax.numpy as jnp
from jax.experimental import pallas as pl
from jax.experimental.pallas import tpu as pltpu


def _round_up(n, m):
    return ((n + m - 1) // m) * m


def mlp_kernel(x_ref, w1_ref, b1_ref, w2_ref, b2_ref, o_ref):
    # Layer 1: (TB, IN) @ (IN, HID) -> f32 accumulate, bias, sigmoid (EUP).
    h = jnp.dot(x_ref[...], w1_ref[...], preferred_element_type=jnp.float32)
    h = jax.nn.sigmoid(h + b1_ref[...])

    # Layer 2: (TB, HID) @ (HID, OUT) -> f32 accumulate, bias, sigmoid.
    # Cast h to the weight dtype (no-op in the f32 path, bf16 in the bf16 path).
    y = jnp.dot(h.astype(w2_ref.dtype), w2_ref[...],
                preferred_element_type=jnp.float32)
    o_ref[...] = jax.nn.sigmoid(y + b2_ref[...]).astype(o_ref.dtype)


def mlp_forward(x, w1_t, b1, w2_t, b2, *, block_b=2048, use_bf16=False):
    """x: (B, IN), w1_t: (IN, HID), b1: (1, HID), w2_t: (HID, OUT),
       b2: (1, OUT)  ->  (B, OUT) float32."""
    B, IN = x.shape
    HID = w1_t.shape[1]
    OUT = w2_t.shape[1]

    if use_bf16:
        # Halve the dominant HBM streams; accumulation / bias / sigmoid stay f32.
        x = x.astype(jnp.bfloat16)
        w1_t = w1_t.astype(jnp.bfloat16)
        w2_t = w2_t.astype(jnp.bfloat16)

    # --- Batch tile selection (no padding of x: Pallas clips the last block).
    #  * sublane-aligned (multiple of 8) unless a single full-extent tile,
    #  * capped so there are >=2 tiles when possible (keeps both v7x TCs busy),
    #  * large by default so DMA per grid step is efficient.
    if B <= 8:
        TB = B                                     # single full-extent tile
    else:
        half = _round_up(pl.cdiv(B, 2), 8)         # >=2 (balanced-ish) tiles
        TB = max(8, min(_round_up(block_b, 8), half))

    grid = (pl.cdiv(B, TB),)

    out = pl.pallas_call(
        mlp_kernel,
        out_shape=jax.ShapeDtypeStruct((B, OUT), jnp.float32),
        grid_spec=pltpu.PrefetchScalarGridSpec(
            num_scalar_prefetch=0,
            grid=grid,
            in_specs=[
                pl.BlockSpec((TB, IN), lambda i: (i, 0)),   # x: batch-tiled
                pl.BlockSpec((IN, HID), lambda i: (0, 0)),  # W1: VMEM-resident
                pl.BlockSpec((1, HID), lambda i: (0, 0)),   # b1: VMEM-resident
                pl.BlockSpec((HID, OUT), lambda i: (0, 0)), # W2: VMEM-resident
                pl.BlockSpec((1, OUT), lambda i: (0, 0)),   # b2: VMEM-resident
            ],
            out_specs=pl.BlockSpec((TB, OUT), lambda i: (i, 0)),
        ),
        compiler_params=pltpu.CompilerParams(
            # Batch tiles are independent -> shard across both TCs on v7x.
            dimension_semantics=("parallel",)),
    )(x, w1_t, b1, w2_t, b2)

    return out


def reference_forward(x, w1_t, b1, w2_t, b2):
    h = jax.nn.sigmoid(x @ w1_t + b1)
    return jax.nn.sigmoid(h @ w2_t + b2)


if __name__ == "__main__":
    # Small shapes consistent with the module:
    #   input=32 features, hidden1=64, output=4, batch=8
    B, IN, HID, OUT = 8, 32, 64, 4

    key = jax.random.PRNGKey(0)
    kx, kw1, kb1, kw2, kb2 = jax.random.split(key, 5)

    x = jax.random.normal(kx, (B, IN), dtype=jnp.float32)

    # nn.Linear-style init (uniform +/- 1/sqrt(fan_in)), torch layout (out, in).
    bound1 = 1.0 / (IN ** 0.5)
    w1 = jax.random.uniform(kw1, (HID, IN), minval=-bound1, maxval=bound1,
                            dtype=jnp.float32)
    b1 = jax.random.uniform(kb1, (1, HID), minval=-bound1, maxval=bound1,
                            dtype=jnp.float32)

    bound2 = 1.0 / (HID ** 0.5)
    w2 = jax.random.uniform(kw2, (OUT, HID), minval=-bound2, maxval=bound2,
                            dtype=jnp.float32)
    b2 = jax.random.uniform(kb2, (1, OUT), minval=-bound2, maxval=bound2,
                            dtype=jnp.float32)

    # Pre-transpose weights so the kernel does x @ W^T as a plain dot.
    w1_t = w1.T  # (IN, HID)
    w2_t = w2.T  # (HID, OUT)

    out = mlp_forward(x, w1_t, b1, w2_t, b2)
    out = jax.block_until_ready(out)

    ref = reference_forward(x, w1_t, b1, w2_t, b2)
    assert out.shape == (B, OUT)
    assert jnp.allclose(out, ref, atol=1e-5, rtol=1e-5), "mismatch vs JAX reference"

    # `prediction` (threshold at 0.5) is trivial host-side glue, shown for parity:
    _pred = (out >= 0.5).astype(jnp.int32)

    print("KERNEL_OK")
</pallas_src>

<mosaic_0001>
module attributes {stable_mosaic.version = 11 : i64} {
  func.func @mlp_kernel(%arg0: i32, %arg1: memref<8x32xf32, #tpu.memory_space<vmem>>, %arg2: memref<32x64xf32, #tpu.memory_space<vmem>>, %arg3: memref<1x64xf32, #tpu.memory_space<vmem>>, %arg4: memref<64x4xf32, #tpu.memory_space<vmem>>, %arg5: memref<1x4xf32, #tpu.memory_space<vmem>>, %arg6: memref<8x4xf32, #tpu.memory_space<vmem>>) attributes {dimension_semantics = [#tpu.dimension_semantics<parallel>], iteration_bounds = array<i64: 1>, scalar_prefetch = 0 : i64, scratch_operands = 0 : i64, tpu.core_type = #tpu.core_type<tc>, window_params = [{transform_indices = @transform_0, window_bounds = array<i64: 8, 32>}, {pipeline_mode = #tpu.pipeline_mode<synchronous>, transform_indices = @transform_1, window_bounds = array<i64: 32, 64>}, {pipeline_mode = #tpu.pipeline_mode<synchronous>, transform_indices = @transform_2, window_bounds = array<i64: 1, 64>}, {pipeline_mode = #tpu.pipeline_mode<synchronous>, transform_indices = @transform_3, window_bounds = array<i64: 64, 4>}, {pipeline_mode = #tpu.pipeline_mode<synchronous>, transform_indices = @transform_4, window_bounds = array<i64: 1, 4>}, {transform_indices = @transform_5, window_bounds = array<i64: 8, 4>}]} {
    %c0 = arith.constant 0 : index
    %c0_0 = arith.constant 0 : index
    %0 = vector.load %arg1[%c0, %c0_0] : memref<8x32xf32, #tpu.memory_space<vmem>>, vector<8x32xf32>
    %c0_1 = arith.constant 0 : index
    %c0_2 = arith.constant 0 : index
    %1 = vector.load %arg2[%c0_1, %c0_2] : memref<32x64xf32, #tpu.memory_space<vmem>>, vector<32x64xf32>
    %cst = arith.constant dense<0.000000e+00> : vector<8x64xf32>
    %2 = tpu.matmul %0, %1, %cst {dimension_numbers = #tpu.dot_dimension_numbers<[1], [0], [0], [1], [0, 0, 1, 1], [], []>} : vector<8x32xf32>, vector<32x64xf32>, vector<8x64xf32> -> vector<8x64xf32>
    %c0_3 = arith.constant 0 : index
    %c0_4 = arith.constant 0 : index
    %3 = vector.load %arg3[%c0_3, %c0_4] : memref<1x64xf32, #tpu.memory_space<vmem>>, vector<1x64xf32>
    %4 = vector.broadcast %3 : vector<1x64xf32> to vector<8x64xf32>
    %5 = arith.addf %2, %4 : vector<8x64xf32>
    %6 = arith.negf %5 : vector<8x64xf32>
    %7 = math.exp %6 : vector<8x64xf32>
    %cst_5 = arith.constant 1.000000e+00 : f32
    %8 = vector.broadcast %cst_5 : f32 to vector<8x64xf32>
    %9 = arith.addf %8, %7 : vector<8x64xf32>
    %10 = arith.divf %8, %9 : vector<8x64xf32>
    %c0_6 = arith.constant 0 : index
    %c0_7 = arith.constant 0 : index
    %11 = vector.load %arg4[%c0_6, %c0_7] : memref<64x4xf32, #tpu.memory_space<vmem>>, vector<64x4xf32>
    %cst_8 = arith.constant dense<0.000000e+00> : vector<8x4xf32>
    %12 = tpu.matmul %10, %11, %cst_8 {dimension_numbers = #tpu.dot_dimension_numbers<[1], [0], [0], [1], [0, 0, 1, 1], [], []>} : vector<8x64xf32>, vector<64x4xf32>, vector<8x4xf32> -> vector<8x4xf32>
    %c0_9 = arith.constant 0 : index
    %c0_10 = arith.constant 0 : index
    %13 = vector.load %arg5[%c0_9, %c0_10] : memref<1x4xf32, #tpu.memory_space<vmem>>, vector<1x4xf32>
    %14 = vector.broadcast %13 : vector<1x4xf32> to vector<8x4xf32>
    %15 = arith.addf %12, %14 : vector<8x4xf32>
    %16 = arith.negf %15 : vector<8x4xf32>
    %17 = math.exp %16 : vector<8x4xf32>
    %cst_11 = arith.constant 1.000000e+00 : f32
    %18 = vector.broadcast %cst_11 : f32 to vector<8x4xf32>
    %19 = arith.addf %18, %17 : vector<8x4xf32>
    %20 = arith.divf %18, %19 : vector<8x4xf32>
    %c0_12 = arith.constant 0 : index
    %c0_13 = arith.constant 0 : index
    %21 = vector.load %arg6[%c0_12, %c0_13] : memref<8x4xf32, #tpu.memory_space<vmem>>, vector<8x4xf32>
    tpu.vector_store %arg6[%c0_12, %c0_13], %20 {strides = array<i32>} : memref<8x4xf32, #tpu.memory_space<vmem>>, vector<8x4xf32>,
    return
  }
  func.func @transform_0(%arg0: i32) -> (i32, i32) {
    %c0_i32 = arith.constant 0 : i32
    %c0_i32_0 = arith.constant 0 : i32
    return %arg0, %c0_i32 : i32, i32
  }
  func.func @transform_1(%arg0: i32) -> (i32, i32) {
    %c0_i32 = arith.constant 0 : i32
    %c0_i32_0 = arith.constant 0 : i32
    %c0_i32_1 = arith.constant 0 : i32
    return %c0_i32, %c0_i32_0 : i32, i32
  }
  func.func @transform_2(%arg0: i32) -> (i32, i32) {
    %c0_i32 = arith.constant 0 : i32
    %c0_i32_0 = arith.constant 0 : i32
    %c0_i32_1 = arith.constant 0 : i32
    return %c0_i32, %c0_i32_0 : i32, i32
  }
  func.func @transform_3(%arg0: i32) -> (i32, i32) {
    %c0_i32 = arith.constant 0 : i32
    %c0_i32_0 = arith.constant 0 : i32
    %c0_i32_1 = arith.constant 0 : i32
    return %c0_i32, %c0_i32_0 : i32, i32
  }
  func.func @transform_4(%arg0: i32) -> (i32, i32) {
    %c0_i32 = arith.constant 0 : i32
    %c0_i32_0 = arith.constant 0 : i32
    %c0_i32_1 = arith.constant 0 : i32
    return %c0_i32, %c0_i32_0 : i32, i32
  }
  func.func @transform_5(%arg0: i32) -> (i32, i32) {
    %c0_i32 = arith.constant 0 : i32
    %c0_i32_0 = arith.constant 0 : i32
    return %arg0, %c0_i32 : i32, i32
  }
}

</mosaic_0001>

<bundles_post_ra>
// kernel: tpu_custom_call.1
= control target key start
LH: loop header
LB: loop body
LE: loop exit
PB: predicated region body
PF: predicated region fallthrough
CT: control target
= control target key end

     0   :  { %v273_v0 = vmov 0.0   ;;  %vm274_vm0 = vmmov 0   ;;  %vm32_vm1 = vcmask 261120   ;;  %vm127_vm2 = vcmask 523264   ;;  %s353_s1 = inlined_call_operand.vmem [shape: f32[32,64], index: 1, kind: input, shape index: {}]   ;;  %s354_s0 = inlined_call_operand.vmem [shape: f32[8,32], index: 0, kind: input, shape index: {}]   ;;  %s355_s3 = inlined_call_operand.vmem [shape: f32[64,4], index: 3, kind: input, shape index: {}]   ;;  %s356_s2 = inlined_call_operand.vmem [shape: f32[1,64], index: 2, kind: input, shape index: {}]   ;;  %s357_s4 = inlined_call_operand.vmem [shape: f32[1,4], index: 4, kind: input, shape index: {}]   ;;  %s358_s5 = inlined_call_operand.vmem [shape: f32[8,4], index: 5, kind: output, shape index: {}]  }
   0x1   :  { %233 = vmatprep.subr.mxu0 %v273_v0  ;;  %v24_v1 = vld [vmem:[%s353_s1 + $0x18] sm:$0xff]  ;;  %v23_v2 = vld [vmem:[%s353_s1 + $0x10] sm:$0xff]  ;;  %241 = vmatprep.mubr.msk.f32.mxu0 %vm274_vm0, %v273_v0  ;;  %v22_v3 = vld [vmem:[%s353_s1 + $0x8] sm:$0xff]  ;;  %vm207_vm3 = vcmask 31744  }
   0x2   :  { %234 = vmatpush3.msra.mxu0 %v24_v1  ;;  %244 = vmatprep.subr.mxu1 %v273_v0  ;;  %v21_v4 = vld [vmem:[%s353_s1] sm:$0xff]  ;;  %v119_v6 = vld [vmem:[%s355_s3 + $0x38] sm:$0xff]  ;;  %v118_v7 = vld [vmem:[%s355_s3 + $0x30] sm:$0xff] }
   0x3   :  { %235 = vmatprep.subr.mxu0 %v273_v0  ;;  %260 = vmatprep.mubr.msk.f32.mxu1 %vm274_vm0, %v273_v0  ;;  %v20_v5 = vld [vmem:[%s354_s0] sm:$0xff]  ;;  %v117_v8 = vld [vmem:[%s355_s3 + $0x28] sm:$0xff]  ;;  %v115_v10 = vld [vmem:[%s355_s3 + $0x18] sm:$0xff] }
   0x4   :  { %236 = vmatpush3.msra.mxu0 %v23_v2  ;;  %245 = vmatpush3.msra.mxu1 %v119_v6  ;;  %v116_v9 = vld [vmem:[%s355_s3 + $0x20] sm:$0xff]  ;;  %v114_v11 = vld [vmem:[%s355_s3 + $0x10] sm:$0xff]  ;;  %v113_v12 = vld [vmem:[%s355_s3 + $0x8] sm:$0xff] }
   0x5   :  { %237 = vmatprep.subr.mxu0 %v273_v0  ;;  %246 = vmatprep.subr.mxu1 %v273_v0  ;;  %v112_v13 = vld [vmem:[%s355_s3] sm:$0xff] }
   0x6   :  { %238 = vmatpush3.msra.mxu0 %v22_v3  ;;  %247 = vmatpush3.msra.mxu1 %v118_v7  ;;  %v213_v14 = vld [vmem:[%s356_s2] ss:$0 sm:$0xff] }
   0x7   :  { %239 = vmatprep.subr.mxu0 %v273_v0  ;;  %248 = vmatprep.subr.mxu1 %v273_v0  ;;  %v216_v22 = vld [vmem:[%s357_s4] ss:$0 sm:$0xff] }
   0x8   :  { %240 = vmatpush3.msra.mxu0 %v21_v4  ;;  %249 = vmatpush3.msra.mxu1 %v117_v8 }
   0x9   :  { %242 = vmatmul.mubr.msk.f32.vlgmr.msra.gmra.mxu0 %vm32_vm1, %v20_v5  ;;  %250 = vmatprep.subr.mxu1 %v273_v0 }
   0xa   :  { %251 = vmatpush3.msra.mxu1 %v116_v9 }
   0xb   :  { %252 = vmatprep.subr.mxu1 %v273_v0 }
   0xc   :  { %253 = vmatpush3.msra.mxu1 %v115_v10 }
   0xd   :  { %254 = vmatprep.subr.mxu1 %v273_v0 }
   0xe   :  { %255 = vmatpush3.msra.mxu1 %v114_v11 }
   0xf   :  { %256 = vmatprep.subr.mxu1 %v273_v0 }
  0x10   :  { %257 = vmatpush3.msra.mxu1 %v113_v12 }
  0x11   :  { %258 = vmatprep.subr.mxu1 %v273_v0 }
  0x12   :  { %259 = vmatpush3.msra.mxu1 %v112_v13 }
  0xc9   :  { %v102_v15 = vpop.f32.mrf.mxu0 }
  0xca   :  { %v103_v16 = vadd.f32 %v213_v14, %v102_v15 }
  0xcb   :  { %v243_v17 = vpop.f32.mrf.mxu0 }
  0xcc   :  { %v215_v18 = vmul.f32 -1.442695, %v103_v16 }
  0xce   :  { %265 = vpow2.f32 %v215_v18 }
  0xdb   :  { %v266_v19 = vpop.eup %265 }
  0xdc   :  { %v109_v20 = vadd.f32 1.0, %v266_v19 }
  0xde   :  { %267 = vrcp.f32 %v109_v20 }
  0xeb   :  { %v268_v21 = vpop.eup %267 }
  0xec   :  { %261 = vmatmul.mubr.msk.f32.vlgmr.msra.gmra.mxu1 %vm127_vm2, %v268_v21 }
 0x1ac   :  { %v197_v23 = vpop.f32.mrf.mxu1 }
 0x1ad   :  { %v198_v24 = vadd.f32 %v216_v22, %v197_v23 }
 0x1ae   :  { %v262_v25 = vpop.f32.mrf.mxu1 }
 0x1af   :  { %v218_v26 = vmul.f32 -1.442695, %v198_v24 }
 0x1b1   :  { %269 = vpow2.f32 %v218_v26 }
 0x1be   :  { %v270_v27 = vpop.eup %269 }
 0x1bf   :  { %v204_v28 = vadd.f32 1.0, %v270_v27 }
 0x1c1   :  { %271 = vrcp.f32 %v204_v28 }
 0x1ce   :  { %v272_v29 = vpop.eup %271 }
 0x1cf   :  { %208 = vst.msk [vmem:[%s358_s5] sm:$0xff] %vm207_vm3, %v272_v29 }

</bundles_post_ra>
